<compile_context>
chip_gen: v7x
topology: tpu7x:2x2x1
jax: 0.10.0
libtpu: 0.0.40
codegen_flags: <defaults>
</compile_context>

<pallas_src>
import functools

import jax
import jax.numpy as jnp
from jax.experimental import pallas as pl
from jax.experimental.pallas import tpu as pltpu


def _round_up(x, m):
    return ((x + m - 1) // m) * m


# ---------------------------------------------------------------------------
# Pallas kernel: fused LayerNorm + affine + Linear(E->H)
# ---------------------------------------------------------------------------
def _bert_emb_kernel(x_ref, gamma_ref, beta_ref, w_ref, b_ref, o_ref, *, eps):
    # Pre-summed word+segment+position embeddings for this row tile.
    # Upcast to f32 for LayerNorm statistics.
    x = x_ref[...].astype(jnp.float32)                       # (tm, E)

    # LayerNorm (norm_mode='normal'): (x - mean) / sqrt(var + eps) * g + b
    u = jnp.mean(x, axis=-1, keepdims=True)
    xc = x - u
    s = jnp.mean(xc * xc, axis=-1, keepdims=True)
    o = xc * jax.lax.rsqrt(s + eps)
    o = gamma_ref[...] * o + beta_ref[...]                   # gamma/beta: (1, E)

    # Dropout is identity in eval mode.
    # embedding_hidden_mapping_in: bf16 operands, f32 accumulation on the MXU.
    y = jnp.dot(o.astype(w_ref.dtype), w_ref[...],
                preferred_element_type=jnp.float32) + b_ref[...]
    o_ref[...] = y.astype(o_ref.dtype)


def bert_embeddings_forward(token_ids, segment_ids, position_ids, params,
                            *, eps=1e-12, row_tile=512, out_dtype=jnp.float32):
    """Glue: gathers + pre-sum + reshape; hot path runs in the Pallas kernel."""
    B, S = token_ids.shape
    word_tab = params["word_embeddings"]          # (V, E)   row 0 == 0 (pad)
    seg_tab = params["segment_embeddings"]        # (SV, E)
    pos_tab = params["position_embeddings"]       # (P, E)
    gamma = params["ln_weight"]                   # (E,)
    beta = params["ln_bias"]                      # (E,)
    w = params["map_weight"]                      # (E, H)
    b = params["map_bias"]                        # (H,)

    E = word_tab.shape[1]
    H = w.shape[1]
    N = B * S

    # ---- glue: gathers, pre-summed into ONE slab (cuts kernel input HBM) ----
    x = jnp.take(word_tab, token_ids, axis=0)                 # (B, S, E)
    x = x + jnp.take(seg_tab, segment_ids, axis=0)            # (B, S, E)
    if position_ids is not None:
        # position_ids may be (1, S): gather once, broadcast-add over batch.
        pos = jnp.take(pos_tab, position_ids, axis=0)         # (B or 1, S, E)
        x = x + pos
    x = x.reshape(N, E).astype(jnp.bfloat16)                  # halve HBM bytes

    # ---- tiling: big row tiles; pad N so any B*S works (no divisibility req) --
    tm = max(8, min(int(row_tile), _round_up(N, 8)))
    n_pad = _round_up(N, tm)
    if n_pad != N:
        # Zero rows are harmless: LN gives 0*rsqrt(eps)=0; rows sliced off below.
        x = jnp.pad(x, ((0, n_pad - N), (0, 0)))
    grid = n_pad // tm

    gamma2 = gamma.reshape(1, E).astype(jnp.float32)
    beta2 = beta.reshape(1, E).astype(jnp.float32)
    w_lo = w.astype(jnp.bfloat16)                              # MXU bf16 weight
    b2 = b.reshape(1, H).astype(jnp.float32)

    # VMEM budget: double-buffered x tile + out tile, weight (worst-case 2
    # copies), plus small vectors and headroom.
    out_itemsize = jnp.dtype(out_dtype).itemsize
    vmem_bytes = (2 * tm * E * 2                # x tile (bf16), double buffered
                  + 2 * tm * H * out_itemsize   # output tile, double buffered
                  + 2 * E * H * 2               # weight (bf16)
                  + 2 * (2 * E * 4 + H * 4))    # gamma/beta/bias
    vmem_limit = min(max(vmem_bytes + (4 << 20), 32 << 20), 100 << 20)

    kernel = functools.partial(_bert_emb_kernel, eps=eps)

    out = pl.pallas_call(
        kernel,
        out_shape=jax.ShapeDtypeStruct((n_pad, H), out_dtype),
        grid_spec=pltpu.PrefetchScalarGridSpec(
            num_scalar_prefetch=0,
            grid=(grid,),
            in_specs=[
                pl.BlockSpec((tm, E), lambda i: (i, 0)),   # summed embeddings
                pl.BlockSpec((1, E), lambda i: (0, 0)),    # gamma (resident)
                pl.BlockSpec((1, E), lambda i: (0, 0)),    # beta  (resident)
                pl.BlockSpec((E, H), lambda i: (0, 0)),    # map weight (resident)
                pl.BlockSpec((1, H), lambda i: (0, 0)),    # map bias   (resident)
            ],
            out_specs=pl.BlockSpec((tm, H), lambda i: (i, 0)),
        ),
        compiler_params=pltpu.CompilerParams(
            dimension_semantics=("parallel",),
            vmem_limit_bytes=vmem_limit),
    )(x, gamma2, beta2, w_lo, b2)

    return out[:N].reshape(B, S, H)


# ---------------------------------------------------------------------------
# Deterministic parameter construction (synthetic, no checkpoint)
# ---------------------------------------------------------------------------
def make_params(key, *, vocab_size, embedding_size, hidden_size,
                max_position, segment_vocab_size, pad_token_id=0):
    k_word, k_pos, k_seg, k_w, k_b, k_g, k_bt = jax.random.split(key, 7)
    word = 0.02 * jax.random.normal(k_word, (vocab_size, embedding_size),
                                    jnp.float32)
    # padding_idx row is zero (matches nn.Embedding(padding_idx=pad_token_id))
    word = word.at[pad_token_id].set(0.0)
    pos = 0.02 * jax.random.normal(k_pos, (max_position, embedding_size),
                                   jnp.float32)
    seg = 0.02 * jax.random.normal(k_seg, (segment_vocab_size, embedding_size),
                                   jnp.float32)
    # LayerNorm params: module init is ones/zeros; perturb slightly so the
    # affine path is actually exercised numerically.
    gamma = 1.0 + 0.1 * jax.random.normal(k_g, (embedding_size,), jnp.float32)
    beta = 0.1 * jax.random.normal(k_bt, (embedding_size,), jnp.float32)
    # embedding_hidden_mapping_in Linear
    w = 0.02 * jax.random.normal(k_w, (embedding_size, hidden_size),
                                 jnp.float32)
    b = 0.01 * jax.random.normal(k_b, (hidden_size,), jnp.float32)
    return {
        "word_embeddings": word,
        "position_embeddings": pos,
        "segment_embeddings": seg,
        "ln_weight": gamma,
        "ln_bias": beta,
        "map_weight": w,
        "map_bias": b,
    }


# ---------------------------------------------------------------------------
if __name__ == "__main__":
    # Lane-dense dims (multiples of 128); E != H so the
    # embedding_hidden_mapping_in Linear path is exercised.
    VOCAB = 100
    EMB = 128
    HID = 256
    MAX_POS = 16
    SEG_VOCAB = 2
    B, S = 2, 8

    key = jax.random.PRNGKey(0)
    k_params, k_tok = jax.random.split(key)

    params = make_params(k_params, vocab_size=VOCAB, embedding_size=EMB,
                         hidden_size=HID, max_position=MAX_POS,
                         segment_vocab_size=SEG_VOCAB)

    token_ids = jax.random.randint(k_tok, (B, S), 1, VOCAB, dtype=jnp.int32)
    segment_ids = jnp.zeros((B, S), dtype=jnp.int32)
    # (1, S): module repeats over batch; glue broadcast-adds the (S, E) slab.
    position_ids = jnp.arange(S, dtype=jnp.int32).reshape(1, S)

    out = bert_embeddings_forward(token_ids, segment_ids, position_ids, params)
    out = jax.block_until_ready(out)

    # Pure-JAX f32 reference of the module forward (eval mode).
    we = jnp.take(params["word_embeddings"], token_ids, axis=0)
    se = jnp.take(params["segment_embeddings"], segment_ids, axis=0)
    pe = jnp.take(params["position_embeddings"],
                  jnp.broadcast_to(position_ids, (B, S)), axis=0)
    x = we + se + pe
    u = x.mean(-1, keepdims=True)
    s = ((x - u) ** 2).mean(-1, keepdims=True)
    o = (x - u) / jnp.sqrt(s + 1e-12)
    o = params["ln_weight"] * o + params["ln_bias"]
    ref = o @ params["map_weight"] + params["map_bias"]

    assert out.shape == (B, S, HID), out.shape
    # bf16 activation slab + bf16 matmul operands (f32 accumulation): expect
    # ~1e-2 relative error vs the pure-f32 reference.
    assert jnp.allclose(out, ref, atol=2e-2, rtol=2e-2), \
        float(jnp.max(jnp.abs(out - ref)))

    print("KERNEL_OK")
</pallas_src>

<mosaic_0001>
module attributes {stable_mosaic.version = 11 : i64} {
  func.func @_bert_emb_kernel(%arg0: i32, %arg1: memref<16x128xbf16, #tpu.memory_space<vmem>>, %arg2: memref<1x128xf32, #tpu.memory_space<vmem>>, %arg3: memref<1x128xf32, #tpu.memory_space<vmem>>, %arg4: memref<128x256xbf16, #tpu.memory_space<vmem>>, %arg5: memref<1x256xf32, #tpu.memory_space<vmem>>, %arg6: memref<16x256xf32, #tpu.memory_space<vmem>>) attributes {dimension_semantics = [#tpu.dimension_semantics<parallel>], iteration_bounds = array<i64: 1>, scalar_prefetch = 0 : i64, scratch_operands = 0 : i64, tpu.core_type = #tpu.core_type<tc>, window_params = [{transform_indices = @transform_0, window_bounds = array<i64: 16, 128>}, {pipeline_mode = #tpu.pipeline_mode<synchronous>, transform_indices = @transform_1, window_bounds = array<i64: 1, 128>}, {pipeline_mode = #tpu.pipeline_mode<synchronous>, transform_indices = @transform_2, window_bounds = array<i64: 1, 128>}, {pipeline_mode = #tpu.pipeline_mode<synchronous>, transform_indices = @transform_3, window_bounds = array<i64: 128, 256>}, {pipeline_mode = #tpu.pipeline_mode<synchronous>, transform_indices = @transform_4, window_bounds = array<i64: 1, 256>}, {transform_indices = @transform_5, window_bounds = array<i64: 16, 256>}]} {
    %c0 = arith.constant 0 : index
    %c0_0 = arith.constant 0 : index
    %0 = vector.load %arg1[%c0, %c0_0] : memref<16x128xbf16, #tpu.memory_space<vmem>>, vector<16x128xbf16>
    %1 = arith.extf %0 : vector<16x128xbf16> to vector<16x128xf32>
    %cst = arith.constant dense<0.000000e+00> : vector<16xf32>
    %2 = vector.multi_reduction <add>, %1, %cst [1] : vector<16x128xf32> to vector<16xf32>
    %3 = vector.shape_cast %2 : vector<16xf32> to vector<16x1xf32>
    %cst_1 = arith.constant 1.280000e+02 : f32
    %4 = vector.broadcast %cst_1 : f32 to vector<16x1xf32>
    %5 = arith.divf %3, %4 : vector<16x1xf32>
    %6 = vector.broadcast %5 : vector<16x1xf32> to vector<16x128xf32>
    %7 = arith.subf %1, %6 : vector<16x128xf32>
    %8 = arith.mulf %7, %7 : vector<16x128xf32>
    %cst_2 = arith.constant dense<0.000000e+00> : vector<16xf32>
    %9 = vector.multi_reduction <add>, %8, %cst_2 [1] : vector<16x128xf32> to vector<16xf32>
    %10 = vector.shape_cast %9 : vector<16xf32> to vector<16x1xf32>
    %cst_3 = arith.constant 1.280000e+02 : f32
    %11 = vector.broadcast %cst_3 : f32 to vector<16x1xf32>
    %12 = arith.divf %10, %11 : vector<16x1xf32>
    %cst_4 = arith.constant 9.99999996E-13 : f32
    %13 = vector.broadcast %cst_4 : f32 to vector<16x1xf32>
    %14 = arith.addf %12, %13 : vector<16x1xf32>
    %15 = math.rsqrt %14 : vector<16x1xf32>
    %16 = vector.broadcast %15 : vector<16x1xf32> to vector<16x128xf32>
    %17 = arith.mulf %7, %16 : vector<16x128xf32>
    %c0_5 = arith.constant 0 : index
    %c0_6 = arith.constant 0 : index
    %18 = vector.load %arg2[%c0_5, %c0_6] : memref<1x128xf32, #tpu.memory_space<vmem>>, vector<1x128xf32>
    %19 = vector.broadcast %18 : vector<1x128xf32> to vector<16x128xf32>
    %20 = arith.mulf %19, %17 : vector<16x128xf32>
    %c0_7 = arith.constant 0 : index
    %c0_8 = arith.constant 0 : index
    %21 = vector.load %arg3[%c0_7, %c0_8] : memref<1x128xf32, #tpu.memory_space<vmem>>, vector<1x128xf32>
    %22 = vector.broadcast %21 : vector<1x128xf32> to vector<16x128xf32>
    %23 = arith.addf %20, %22 : vector<16x128xf32>
    %24 = arith.truncf %23 : vector<16x128xf32> to vector<16x128xbf16>
    %c0_9 = arith.constant 0 : index
    %c0_10 = arith.constant 0 : index
    %25 = vector.load %arg4[%c0_9, %c0_10] : memref<128x256xbf16, #tpu.memory_space<vmem>>, vector<128x256xbf16>
    %cst_11 = arith.constant dense<0.000000e+00> : vector<16x256xf32>
    %26 = tpu.matmul %24, %25, %cst_11 {dimension_numbers = #tpu.dot_dimension_numbers<[1], [0], [0], [1], [0, 0, 1, 1], [], []>} : vector<16x128xbf16>, vector<128x256xbf16>, vector<16x256xf32> -> vector<16x256xf32>
    %c0_12 = arith.constant 0 : index
    %c0_13 = arith.constant 0 : index
    %27 = vector.load %arg5[%c0_12, %c0_13] : memref<1x256xf32, #tpu.memory_space<vmem>>, vector<1x256xf32>
    %28 = vector.broadcast %27 : vector<1x256xf32> to vector<16x256xf32>
    %29 = arith.addf %26, %28 : vector<16x256xf32>
    %c0_14 = arith.constant 0 : index
    %c0_15 = arith.constant 0 : index
    %30 = vector.load %arg6[%c0_14, %c0_15] : memref<16x256xf32, #tpu.memory_space<vmem>>, vector<16x256xf32>
    tpu.vector_store %arg6[%c0_14, %c0_15], %29 {strides = array<i32>} : memref<16x256xf32, #tpu.memory_space<vmem>>, vector<16x256xf32>,
    return
  }
  func.func @transform_0(%arg0: i32) -> (i32, i32) {
    %c0_i32 = arith.constant 0 : i32
    %c0_i32_0 = arith.constant 0 : i32
    return %arg0, %c0_i32 : i32, i32
  }
  func.func @transform_1(%arg0: i32) -> (i32, i32) {
    %c0_i32 = arith.constant 0 : i32
    %c0_i32_0 = arith.constant 0 : i32
    %c0_i32_1 = arith.constant 0 : i32
    return %c0_i32, %c0_i32_0 : i32, i32
  }
  func.func @transform_2(%arg0: i32) -> (i32, i32) {
    %c0_i32 = arith.constant 0 : i32
    %c0_i32_0 = arith.constant 0 : i32
    %c0_i32_1 = arith.constant 0 : i32
    return %c0_i32, %c0_i32_0 : i32, i32
  }
  func.func @transform_3(%arg0: i32) -> (i32, i32) {
    %c0_i32 = arith.constant 0 : i32
    %c0_i32_0 = arith.constant 0 : i32
    %c0_i32_1 = arith.constant 0 : i32
    return %c0_i32, %c0_i32_0 : i32, i32
  }
  func.func @transform_4(%arg0: i32) -> (i32, i32) {
    %c0_i32 = arith.constant 0 : i32
    %c0_i32_0 = arith.constant 0 : i32
    %c0_i32_1 = arith.constant 0 : i32
    return %c0_i32, %c0_i32_0 : i32, i32
  }
  func.func @transform_5(%arg0: i32) -> (i32, i32) {
    %c0_i32 = arith.constant 0 : i32
    %c0_i32_0 = arith.constant 0 : i32
    return %arg0, %c0_i32 : i32, i32
  }
}

</mosaic_0001>

<bundles_post_ra>
// kernel: tpu_custom_call.1
= control target key start
LH: loop header
LB: loop body
LE: loop exit
PB: predicated region body
PF: predicated region fallthrough
CT: control target
= control target key end

     0   :  { %10 = vsyncpa [#allocation3], 0  ;;  %s486_s0 = inlined_call_operand.hbm [shape: bf16[16,128], index: 0, kind: input, shape index: {}]   ;;  %s487_s1 = inlined_call_operand.vmem [shape: f32[1,128], index: 1, kind: input, shape index: {}]   ;;  %s488_s2 = inlined_call_operand.vmem [shape: f32[1,128], index: 2, kind: input, shape index: {}]   ;;  %s489_s3 = inlined_call_operand.hbm [shape: bf16[128,256], index: 3, kind: input, shape index: {}]   ;;  %s490_s4 = inlined_call_operand.vmem [shape: f32[1,256], index: 4, kind: input, shape index: {}]   ;;  %s491_s5 = inlined_call_operand.hbm [shape: f32[16,256], index: 5, kind: output, shape index: {}]  }
   0x1   :  { %11 = vsyncpa [#allocation6], 0 }
   0x2   :  { %12 = vsyncpa [#allocation4], 0  ;;  %s401_s18 = smov [#allocation2]   ;;  %s329_s22 = scalar_lea.hbm %s486_s0, 128 }
   0x3   :  { %s18_s19 = sshll.u32 %s401_s18, 4  ;;  %p330_p0 = scmp.ne.s32.totalorder %s486_s0, %s329_s22  ;;  %s19_s19 = int_to_ptr.vmem [resolvable:$true] %s18_s19 }
   0x4   :  { %p333_p1 = scmp.lt.u32.totalorder %s329_s22, %s486_s0 }
   0x6   :  { %p335_p2 = pnand %p333_p1, %p330_p0 }
   0x8   :  { %338 = shalt.err (!%p335_p2)
}
   0x9   :  { %s339_s27 = scalar_lea.vmem %s19_s19, 128  ;;  %p344_p4 = scmp.lt.s32.totalorder %s19_s19, %s19_s19 }
   0xa   :  { %p340_p3 = scmp.ne.s32.totalorder %s19_s19, %s339_s27  ;;  %p345_p5 = scmp.lt.s32.totalorder %s339_s27, %s339_s27 }
   0xc   :  { %p346_p6 = por %p345_p5, %p344_p4 }
   0xe   :  { %p347_p7 = pnand %p346_p6, %p340_p3 }
  0x10   :  { %350 = shalt.err (!%p347_p7)
}
  0x11   :  { %s402_s28 = smov 64   ;;  %s403_s29 = smov 4  }
  0x12   :  { %24 = dma.hbm_to_vmem [thread:$0]  %s486_s0, 128, %s19_s19, [#allocation3], %s402_s28, %s402_s28, %s403_s29  }
  0x13   :  { %s404_s7 = smov [#allocation5]   ;;  %s351_s11 = scalar_lea.hbm %s489_s3, 2048 }
  0x14   :  { %s34_s8 = sshll.u32 %s404_s7, 4  ;;  %p352_p8 = scmp.ne.s32.totalorder %s489_s3, %s351_s11  ;;  %s35_s8 = int_to_ptr.vmem [resolvable:$true] %s34_s8 }
  0x15   :  { %p355_p9 = scmp.lt.u32.totalorder %s351_s11, %s489_s3 }
  0x17   :  { %p357_p10 = pnand %p355_p9, %p352_p8 }
  0x19   :  { %360 = shalt.err (!%p357_p10)
}
  0x1a   :  { %s361_s16 = scalar_lea.vmem %s35_s8, 2048  ;;  %p366_p12 = scmp.lt.s32.totalorder %s35_s8, %s35_s8 }
  0x1b   :  { %p362_p11 = scmp.ne.s32.totalorder %s35_s8, %s361_s16  ;;  %p367_p13 = scmp.lt.s32.totalorder %s361_s16, %s361_s16 }
  0x1d   :  { %p368_p0 = por %p367_p13, %p366_p12 }
  0x1f   :  { %p369_p1 = pnand %p368_p0, %p362_p11 }
  0x21   :  { %372 = shalt.err (!%p369_p1)
}
  0x22   :  { %s405_s0 = smov 128   ;;  %s406_s17 = smov 8  }
  0x23   :  { %40 = dma.hbm_to_vmem [thread:$0]  %s489_s3, 2048, %s35_s8, [#allocation6], %s405_s0, %s405_s0, %s406_s17  }
  0x24   :  { %395 = dma.done.wait [#allocation3], 128  }
  0x25   :  { %396 = vsyncadd [#allocation3], 4294967168 }
  0x26   :  { %397 = dma.done.wait [#allocation6], 2048  }
  0x27   :  { %398 = vsyncadd [#allocation6], 4294965248  ;;  %v288_v0 = vld [vmem:[#allocation2] sm:$0xff]   ;;  %v301_v3 = vld [vmem:[#allocation5 + $0x4] ss:$8 sps:$4 sm:$0xff]   ;;  %v407_v22 = vmov 0   ;;  %v114_v45 = vlaneseq }
  0x28   :  { %v289_v1 = vunpack.c.l.bf16 %v288_v0  ;;  %v290_v2 = vunpack.c.h.bf16 %v288_v0  ;;  %v303_v4 = vld [vmem:[#allocation5] ss:$8 sps:$4 sm:$0xff]   ;;  %v304_v5 = vld [vmem:[#allocation5 + $0x14] ss:$8 sps:$4 sm:$0xff]   ;;  %204 = vmatprep.subr.bf16.mxu0 %v301_v3  ;;  %v306_v14 = vld [vmem:[#allocation5 + $0x10] ss:$8 sps:$4 sm:$0xff]   ;;  %236 = vmatprep.mubr.bf16.mxu0 %v407_v22 }
  0x29   :  { %205 = vmatpush1.bf16.msra.mxu0 %v303_v4  ;;  %v307_v15 = vld [vmem:[#allocation5 + $0x24] ss:$8 sps:$4 sm:$0xff]   ;;  %v309_v16 = vld [vmem:[#allocation5 + $0x20] ss:$8 sps:$4 sm:$0xff]   ;;  %v310_v17 = vld [vmem:[#allocation5 + $0x34] ss:$8 sps:$4 sm:$0xff]  }
  0x2a   :  { %54 = vadd.xlane.f32.xlu0 %v289_v1  ;;  %206 = vmatprep.subr.bf16.mxu0 %v304_v5  ;;  %v312_v18 = vld [vmem:[#allocation5 + $0x30] ss:$8 sps:$4 sm:$0xff]   ;;  %v313_v19 = vld [vmem:[#allocation5 + $0x44] ss:$8 sps:$4 sm:$0xff]   ;;  %v315_v20 = vld [vmem:[#allocation5 + $0x40] ss:$8 sps:$4 sm:$0xff]  }
  0x2b   :  { %v316_v21 = vld [vmem:[#allocation5 + $0x54] ss:$8 sps:$4 sm:$0xff]   ;;  %v318_v23 = vld [vmem:[#allocation5 + $0x50] ss:$8 sps:$4 sm:$0xff]   ;;  %v319_v24 = vld [vmem:[#allocation5 + $0x64] ss:$8 sps:$4 sm:$0xff]  }
  0x2c   :  { %v321_v25 = vld [vmem:[#allocation5 + $0x60] ss:$8 sps:$4 sm:$0xff]   ;;  %v322_v26 = vld [vmem:[#allocation5 + $0x74] ss:$8 sps:$4 sm:$0xff]   ;;  %v324_v27 = vld [vmem:[#allocation5 + $0x70] ss:$8 sps:$4 sm:$0xff]  }
  0x2d   :  { %207 = vmatpush1.bf16.msra.mxu0 %v306_v14  ;;  %v269_v36 = vld [vmem:[%s487_s1] ss:$0 sm:$0xff]  ;;  %v115_v46 = vshrl.u32 %v114_v45, 7  ;;  %s408_s1 = smov [#allocation7]  }
  0x2e   :  { %56 = vadd.xlane.f32.xlu0 %v290_v2  ;;  %208 = vmatprep.subr.bf16.mxu0 %v307_v15  ;;  %v270_v40 = vld [vmem:[%s488_s2] ss:$0 sm:$0xff]  ;;  %s256_s25 = sshll.u32 %s408_s1, 4  ;;  %s257_s25 = int_to_ptr.vmem [resolvable:$true] %s256_s25 }
  0x2f   :  { %v116_v47 = vsub.s32 0, %v115_v46  ;;  %v112_v48 = vld [vmem:[%s490_s4] sm:$0x3]  ;;  %v120_v49 = vsub.s32 1, %v115_v46  ;;  %s373_s2 = scalar_lea.vmem %s257_s25, 512  ;;  %p378_p3 = scmp.lt.s32.totalorder %s257_s25, %s257_s25 }
  0x30   :  { %p374_p2 = scmp.ne.s32.totalorder %s257_s25, %s373_s2  ;;  %p379_p4 = scmp.lt.s32.totalorder %s373_s2, %s373_s2 }
  0x31   :  { %209 = vmatpush1.bf16.msra.mxu0 %v309_v16  ;;  %v117_v50 = vrot.slane %v112_v48, %v116_v47  ;;  %v121_v51 = vrot.slane %v112_v48, %v120_v49 }
  0x32   :  { %210 = vmatprep.subr.bf16.mxu0 %v310_v17  ;;  %p380_p5 = por %p379_p4, %p378_p3 }
  0x34   :  { %p381_p6 = pnand %p380_p5, %p374_p2 }
  0x35   :  { %211 = vmatpush1.bf16.msra.mxu0 %v312_v18 }
  0x36   :  { %212 = vmatprep.subr.bf16.mxu0 %v313_v19 }
  0x39   :  { %213 = vmatpush1.bf16.msra.mxu0 %v315_v20 }
  0x3a   :  { %214 = vmatprep.subr.bf16.mxu0 %v316_v21 }
  0x3d   :  { %215 = vmatpush1.bf16.msra.mxu0 %v318_v23 }
  0x3e   :  { %216 = vmatprep.subr.bf16.mxu0 %v319_v24 }
  0x41   :  { %217 = vmatpush1.bf16.msra.mxu0 %v321_v25 }
  0x42   :  { %218 = vmatprep.subr.bf16.mxu0 %v322_v26 }
  0x45   :  { %219 = vmatpush1.bf16.msra.mxu0 %v324_v27 }
  0xb7   :  { %v55_v6 = vpop.xlane.xlu0 %54 }
  0xb8   :  { %v59_v7 = vmul.f32 0.0078125, %v55_v6 }
  0xba   :  { %v61_v8 = vsub.f32 %v289_v1, %v59_v7 }
  0xbb   :  { %v57_v9 = vpop.xlane.xlu0 %56 }
  0xbc   :  { %v60_v10 = vmul.f32 0.0078125, %v57_v9  ;;  %v63_v11 = vmul.f32 %v61_v8, %v61_v8 }
  0xbe   :  { %v62_v12 = vsub.f32 %v290_v2, %v60_v10  ;;  %65 = vadd.xlane.f32.xlu1 %v63_v11 }
  0xc0   :  { %v64_v13 = vmul.f32 %v62_v12, %v62_v12 }
  0xc2   :  { %67 = vadd.xlane.f32.xlu1 %v64_v13 }
 0x14b   :  { %v66_v28 = vpop.xlane.xlu1 %65 }
 0x14c   :  { %v69_v29 = vmul.f32 0.0078125, %v66_v28 }
 0x14e   :  { %v71_v30 = vadd.f32 1e-12, %v69_v29 }
 0x14f   :  { %v68_v31 = vpop.xlane.xlu1 %67 }
 0x150   :  { %325 = vrsqrt.f32 %v71_v30  ;;  %v70_v32 = vmul.f32 0.0078125, %v68_v31 }
 0x152   :  { %v72_v33 = vadd.f32 1e-12, %v70_v32 }
 0x154   :  { %327 = vrsqrt.f32 %v72_v33 }
 0x15a   :  { %v326_v34 = vpop.eup %325 }
 0x15b   :  { %v75_v35 = vmul.f32 %v326_v34, %v61_v8 }
 0x15d   :  { %v84_v39 = vmul.f32 %v269_v36, %v75_v35 }
 0x15e   :  { %v328_v37 = vpop.eup %327 }
 0x15f   :  { %v76_v38 = vmul.f32 %v328_v37, %v62_v12  ;;  %v93_v42 = vadd.f32 %v270_v40, %v84_v39 }
 0x161   :  { %v85_v41 = vmul.f32 %v269_v36, %v76_v38 }
 0x163   :  { %v94_v43 = vadd.f32 %v270_v40, %v85_v41 }
 0x165   :  { %v95_v44 = vpack.c.bf16 %v94_v43, %v93_v42 }
 0x167   :  { %237 = vmatmul.mubr.bf16.vlgmr.msra.gmra.mrb[0].mxu0 %v95_v44 }
 0x23a   :  { %v238_v52 = vpop.f32.mrb[0].mxu0 }
 0x23b   :  { %v239_v53 = vadd.f32 %v238_v52, %v117_v50  ;;  %v240_v54 = vpop.f32.mrb[1].mxu0 }
 0x23c   :  { %v241_v55 = vadd.f32 %v240_v54, %v121_v51  ;;  %v242_v56 = vpop.f32.mrb[2].mxu0 }
 0x23d   :  { %247 = vst [vmem:[#allocation7] sm:$0xff] %v239_v53  ;;  %v243_v57 = vadd.f32 %v242_v56, %v117_v50  ;;  %v244_v58 = vpop.f32.mrb[3].mxu0 }
 0x23e   :  { %248 = vst [vmem:[#allocation7 + $0x8] sm:$0xff] %v241_v55  ;;  %v245_v59 = vadd.f32 %v244_v58, %v121_v51 }
 0x23f   :  { %249 = vst [vmem:[#allocation7 + $0x10] sm:$0xff] %v243_v57 }
 0x240   :  { %250 = vst [vmem:[#allocation7 + $0x18] sm:$0xff] %v245_v59 }
 0x241   :  { %384 = shalt.err (!%p381_p6)
}
 0x242   :  { %s385_s27 = scalar_lea.hbm %s491_s5, 512 }
 0x243   :  { %p386_p7 = scmp.ne.s32.totalorder %s491_s5, %s385_s27  ;;  %p389_p8 = scmp.lt.u32.totalorder %s385_s27, %s491_s5 }
 0x245   :  { %p391_p9 = pnand %p389_p8, %p386_p7 }
 0x247   :  { %394 = shalt.err (!%p391_p9)
}
 0x248   :  { %s409_s7 = smov 256   ;;  %s410_s8 = smov 16  }
 0x249   :  { %262 = dma.vmem_to_hbm [thread:$0]  %s257_s25, 512, %s491_s5, [#allocation4], %s409_s7, %s409_s7, %s410_s8  }
 0x24a   :  { %399 = dma.done.wait [#allocation4], 512  }
 0x24b   :  { %400 = vsyncadd [#allocation4], 4294966784 }
 0x24c   :  { %266 = vsyncpa [#allocation3], 1 }
 0x24d   :  { %267 = vsyncpa [#allocation6], 1 }
 0x24e   :  { %268 = vsyncpa [#allocation4], 1 }

</bundles_post_ra>
